<compile_context>
chip_gen: v5e
topology: v5e:2x2
jax: 0.10.0
libtpu: 0.0.40
codegen_flags: <defaults>
</compile_context>

<pallas_src>
import functools

import numpy as np
import jax
import jax.numpy as jnp
from jax import lax
from jax.experimental import pallas as pl
from jax.experimental.pallas import tpu as pltpu

_MIB = 1 << 20
_TILE_BUDGET = 32 * _MIB          # max double-buffered working set we aim for
_VMEM_CAP = 48 * _MIB             # never request more scoped VMEM (v7x: 64 MiB phys)
_DEFAULT_SCOPED_SAFE = 10 * _MIB  # below this, leave the default scoped limit alone


def _pick_tile(dim, preferred, align):
    """Largest tile <= preferred that divides dim and is align-aligned (else full dim)."""
    if dim <= preferred:
        return dim
    t = (preferred // align) * align
    while t >= align:
        if dim % t == 0:
            return t
        t -= align
    # TODO(synk): pad/mask awkward (e.g. prime) dims instead of the full-dim fallback.
    return dim


def _compiler_params(est_bytes, dims, vmem_limit_bytes):
    kw = dict(dimension_semantics=dims)
    if vmem_limit_bytes is None and est_bytes > _DEFAULT_SCOPED_SAFE:
        vmem_limit_bytes = min(int(est_bytes * 3) // 2, _VMEM_CAP)
    if vmem_limit_bytes is not None:
        kw["vmem_limit_bytes"] = int(min(vmem_limit_bytes, _VMEM_CAP))
    return pltpu.CompilerParams(**kw)


# --------------- fused small-batch path (single batch tile) -------------------

def _fused_kernel(x_ref, conn_kj, nn_kj, sc_kj, conn_jk, w_jk, b_ref, o_ref,
                  *, compute_dtype):
    k = pl.program_id(2)
    # Build the (tk, tn) W_eff tile in-register.  conn_jk / w_jk are the (j, k)
    # blocks of the original arrays; the transpose runs on the XLU and hides
    # under DMA.  Elementwise math in f32, cast to the MXU compute dtype.
    w_tile = ((conn_kj[...] * nn_kj[...] + conn_jk[...].T * sc_kj[...])
              * w_jk[...].T).astype(compute_dtype)
    contrib = jnp.dot(x_ref[...].astype(compute_dtype), w_tile,
                      preferred_element_type=jnp.float32)

    @pl.when(k == 0)
    def _():
        o_ref[...] = contrib + b_ref[...]

    @pl.when(k != 0)
    def _():
        o_ref[...] = o_ref[...] + contrib


def _fused_forward(x, connections, nearest_neighbors, self_connections, weight,
                   bias, *, compute_dtype, tm, tn, vmem_limit_bytes):
    B, K = x.shape
    N = connections.shape[1]

    def est(tk):
        # double-buffered: x (f32) + 5 f32 param streams + f32 out + bias
        return 2 * (tm * tk * 4 + 5 * tk * tn * 4 + tm * tn * 4 + tn * 4)

    tk = None
    for pref in (K, 1024, 512, 256, 128):       # prefer collapsing the k axis
        cand = _pick_tile(K, pref, 128)
        if est(cand) <= _TILE_BUDGET:
            tk = cand
            break
    if tk is None:
        tk = _pick_tile(K, 128, 128)

    bias2d = bias.reshape(1, N)
    kernel = functools.partial(_fused_kernel, compute_dtype=compute_dtype)
    return pl.pallas_call(
        kernel,
        out_shape=jax.ShapeDtypeStruct((B, N), jnp.float32),
        grid_spec=pltpu.PrefetchScalarGridSpec(
            num_scalar_prefetch=0,
            grid=(B // tm, N // tn, K // tk),
            in_specs=[
                pl.BlockSpec((tm, tk), lambda i, j, k: (i, k)),   # x
                pl.BlockSpec((tk, tn), lambda i, j, k: (k, j)),   # connections
                pl.BlockSpec((tk, tn), lambda i, j, k: (k, j)),   # nearest_neighbors
                pl.BlockSpec((tk, tn), lambda i, j, k: (k, j)),   # self_connections
                pl.BlockSpec((tn, tk), lambda i, j, k: (j, k)),   # connections (T src)
                pl.BlockSpec((tn, tk), lambda i, j, k: (j, k)),   # weight (T src)
                pl.BlockSpec((1, tn), lambda i, j, k: (0, j)),    # bias
            ],
            out_specs=pl.BlockSpec((tm, tn), lambda i, j, k: (i, j)),
        ),
        compiler_params=_compiler_params(
            est(tk), ("parallel", "parallel", "arbitrary"), vmem_limit_bytes),
    )(x, connections, nearest_neighbors, self_connections, connections, weight,
      bias2d)


# --------------- pass 1 (large batch): W_eff builder, runs once ----------------

def _build_weff_kernel(conn_ref, nn_ref, sc_ref, connT_ref, wT_ref, weff_ref):
    weff = ((conn_ref[...] * nn_ref[...] + connT_ref[...].T * sc_ref[...])
            * wT_ref[...].T)
    weff_ref[...] = weff.astype(weff_ref.dtype)


def build_w_eff(connections, nearest_neighbors, self_connections, weight,
                *, out_dtype=jnp.bfloat16, tr=512, tc=512):
    N, M = connections.shape
    assert N == M, "SelfConnectedSparseLayer math requires in_features == out_features"
    # Both tr and tc appear as lane dims (the transposed-source blocks are (tc, tr)).
    tr = _pick_tile(N, tr, 128)
    tc = _pick_tile(N, tc, 128)
    spec_ij = pl.BlockSpec((tr, tc), lambda i, j: (i, j))
    spec_ji = pl.BlockSpec((tc, tr), lambda i, j: (j, i))
    out_bytes = np.dtype(out_dtype).itemsize
    est = 2 * (5 * tr * tc * 4 + tr * tc * out_bytes)
    return pl.pallas_call(
        _build_weff_kernel,
        out_shape=jax.ShapeDtypeStruct((N, N), out_dtype),
        grid_spec=pltpu.PrefetchScalarGridSpec(
            num_scalar_prefetch=0,
            grid=(N // tr, N // tc),
            in_specs=[spec_ij, spec_ij, spec_ij, spec_ji, spec_ji],
            out_specs=spec_ij,
        ),
        compiler_params=_compiler_params(est, ("parallel", "parallel"), None),
    )(connections, nearest_neighbors, self_connections, connections, weight)


# --------------- pass 2 (large batch): tiled matmul + bias ---------------------

def _matmul_bias_kernel(x_ref, w_ref, b_ref, o_ref):
    k = pl.program_id(2)
    contrib = jnp.dot(x_ref[...], w_ref[...], preferred_element_type=jnp.float32)

    @pl.when(k == 0)
    def _():
        o_ref[...] = contrib + b_ref[...]

    @pl.when(k != 0)
    def _():
        o_ref[...] = o_ref[...] + contrib


def matmul_bias(x, w_eff, bias, *, tm, tn, vmem_limit_bytes=None):
    B, K = x.shape
    K2, N = w_eff.shape
    assert K == K2
    x_bytes = x.dtype.itemsize
    w_bytes = w_eff.dtype.itemsize

    def est(tk):
        return 2 * (tm * tk * x_bytes + tk * tn * w_bytes + tm * tn * 4 + tn * 4)

    tk = None
    for pref in (K, 1024, 512, 256, 128):       # prefer a single k step
        cand = _pick_tile(K, pref, 128)
        if est(cand) <= _TILE_BUDGET:
            tk = cand
            break
    if tk is None:
        tk = _pick_tile(K, 128, 128)

    bias2d = bias.reshape(1, N)
    return pl.pallas_call(
        _matmul_bias_kernel,
        out_shape=jax.ShapeDtypeStruct((B, N), jnp.float32),
        grid_spec=pltpu.PrefetchScalarGridSpec(
            num_scalar_prefetch=0,
            grid=(B // tm, N // tn, K // tk),
            in_specs=[
                pl.BlockSpec((tm, tk), lambda i, j, k: (i, k)),   # x
                pl.BlockSpec((tk, tn), lambda i, j, k: (k, j)),   # W_eff
                pl.BlockSpec((1, tn), lambda i, j, k: (0, j)),    # bias
            ],
            out_specs=pl.BlockSpec((tm, tn), lambda i, j, k: (i, j)),
        ),
        compiler_params=_compiler_params(
            est(tk), ("parallel", "parallel", "arbitrary"), vmem_limit_bytes),
    )(x, w_eff, bias2d)


# --------------- public forward -----------------------------------------------

def self_connected_sparse_forward(x, connections, nearest_neighbors,
                                  self_connections, weight, bias,
                                  *, compute_dtype=jnp.bfloat16,
                                  tm=512, tn=512, vmem_limit_bytes=None):
    B, K = x.shape
    N, M = connections.shape
    assert N == M == K, "broadcasting in the torch module requires in==out features"

    # No batch splitting: keep tm = min(B, 512); 16-row alignment for bf16 packing.
    row_align = 16 if np.dtype(compute_dtype).itemsize == 2 else 8
    tm = _pick_tile(B, min(tm, B), row_align)

    tn_pref = min(tn, N)
    if B // tm == 1 and N >= 256:
        # Single batch tile: give the 'parallel' j axis >= 2 steps so v7x's
        # second TensorCore has work.
        tn_pref = min(tn_pref, N // 2)
    tn = _pick_tile(N, tn_pref, 128)

    if B // tm == 1:
        # Small-batch fast path: fuse W_eff tile construction into the matmul,
        # avoiding the N^2 HBM write + re-read and a second pallas_call.
        return _fused_forward(x, connections, nearest_neighbors,
                              self_connections, weight, bias,
                              compute_dtype=compute_dtype, tm=tm, tn=tn,
                              vmem_limit_bytes=vmem_limit_bytes)

    # Large-batch path: batch-independent W_eff built exactly once, then matmul.
    w_eff = build_w_eff(connections, nearest_neighbors, self_connections, weight,
                        out_dtype=compute_dtype)
    return matmul_bias(x.astype(compute_dtype), w_eff, bias, tm=tm, tn=tn,
                       vmem_limit_bytes=vmem_limit_bytes)


# --------------- deterministic parameter init (mirrors the torch __init__) ----

def init_params(key, n_features, sparsity=0.5, self_connection=0.5):
    k_conn, k_self, k_w = jax.random.split(key, 3)

    # connections: random 0/1 mask with exactly max_connections ones
    max_connections = int(n_features * n_features * sparsity)
    perm = jax.random.permutation(k_conn, n_features * n_features)
    conn_flat = jnp.zeros((n_features * n_features,), jnp.float32)
    conn_flat = conn_flat.at[perm[:max_connections]].set(1.0)
    connections = conn_flat.reshape(n_features, n_features)

    # nearest_neighbors: tridiagonal band of ones
    idx = jnp.arange(n_features)
    nearest_neighbors = (jnp.abs(idx[:, None] - idx[None, :]) <= 1).astype(jnp.float32)

    # self_connections: per-row random subset of size int(N * self_connection)
    num_self = int(n_features * self_connection)
    row_keys = jax.random.split(k_self, n_features)
    perms = jax.vmap(lambda k: jax.random.permutation(k, n_features))(row_keys)
    sel = perms[:, :num_self]
    self_connections = jnp.zeros((n_features, n_features), jnp.float32)
    self_connections = self_connections.at[idx[:, None], sel].set(1.0)

    # weight: xavier uniform (out_features, in_features)
    bound = (6.0 / (n_features + n_features)) ** 0.5
    weight = jax.random.uniform(k_w, (n_features, n_features), jnp.float32,
                                minval=-bound, maxval=bound)

    bias = jnp.zeros((n_features,), jnp.float32)
    return connections, nearest_neighbors, self_connections, weight, bias


def reference_forward(x, connections, nearest_neighbors, self_connections,
                      weight, bias, compute_dtype=jnp.float32):
    w_eff = (connections * nearest_neighbors
             + connections.T * self_connections) * weight.T
    xc = x.astype(compute_dtype).astype(jnp.float32)
    wc = w_eff.astype(compute_dtype).astype(jnp.float32)
    return jnp.dot(xc, wc, precision=lax.Precision.HIGHEST) + bias


if __name__ == "__main__":
    key = jax.random.PRNGKey(0)
    k_params, k_x1, k_x2 = jax.random.split(key, 3)

    N = 128   # in_features == out_features (lane-aligned)
    params = init_params(k_params, N)

    # --- Path 1: fused small-batch path, default bf16 MXU compute -------------
    B1 = 16
    x1 = jax.random.normal(k_x1, (B1, N), jnp.float32)
    fwd = jax.jit(self_connected_sparse_forward)
    out1 = jax.block_until_ready(fwd(x1, *params))
    ref1 = reference_forward(x1, *params, compute_dtype=jnp.bfloat16)
    assert out1.shape == (B1, N)
    # bf16 compute is intentionally lower precision than the torch f32 module;
    # compare against a bf16-rounded reference with a loose tolerance.
    assert jnp.allclose(out1, ref1, atol=2e-3, rtol=2e-3), "fused bf16 path mismatch"

    # --- Path 2: two-pass path (W_eff build + tiled matmul), f32 --------------
    # tm forced small so the batch axis has more than one tile and the
    # large-batch code path is exercised at a small shape.
    B2 = 32
    x2 = jax.random.normal(k_x2, (B2, N), jnp.float32)
    fwd2 = jax.jit(functools.partial(self_connected_sparse_forward,
                                     compute_dtype=jnp.float32, tm=16))
    out2 = jax.block_until_ready(fwd2(x2, *params))
    ref2 = reference_forward(x2, *params)
    assert out2.shape == (B2, N)
    assert jnp.allclose(out2, ref2, atol=1e-4, rtol=1e-4), "two-pass f32 path mismatch"

    print("KERNEL_OK")
</pallas_src>

<mosaic_0001>
module attributes {stable_mosaic.version = 11 : i64} {
  func.func @_fused_kernel(%arg0: i32, %arg1: i32, %arg2: i32, %arg3: memref<16x128xf32, #tpu.memory_space<vmem>>, %arg4: memref<128x128xf32, #tpu.memory_space<vmem>>, %arg5: memref<128x128xf32, #tpu.memory_space<vmem>>, %arg6: memref<128x128xf32, #tpu.memory_space<vmem>>, %arg7: memref<128x128xf32, #tpu.memory_space<vmem>>, %arg8: memref<128x128xf32, #tpu.memory_space<vmem>>, %arg9: memref<1x128xf32, #tpu.memory_space<vmem>>, %arg10: memref<16x128xf32, #tpu.memory_space<vmem>>) attributes {dimension_semantics = [#tpu.dimension_semantics<parallel>, #tpu.dimension_semantics<parallel>, #tpu.dimension_semantics<arbitrary>], iteration_bounds = array<i64: 1, 1, 1>, scalar_prefetch = 0 : i64, scratch_operands = 0 : i64, tpu.core_type = #tpu.core_type<tc>, window_params = [{transform_indices = @transform_0, window_bounds = array<i64: 16, 128>}, {transform_indices = @transform_1, window_bounds = array<i64: 128, 128>}, {transform_indices = @transform_2, window_bounds = array<i64: 128, 128>}, {transform_indices = @transform_3, window_bounds = array<i64: 128, 128>}, {transform_indices = @transform_4, window_bounds = array<i64: 128, 128>}, {transform_indices = @transform_5, window_bounds = array<i64: 128, 128>}, {transform_indices = @transform_6, window_bounds = array<i64: 1, 128>}, {transform_indices = @transform_7, window_bounds = array<i64: 16, 128>}]} {
    %c0 = arith.constant 0 : index
    %c0_0 = arith.constant 0 : index
    %0 = vector.load %arg4[%c0, %c0_0] : memref<128x128xf32, #tpu.memory_space<vmem>>, vector<128x128xf32>
    %c0_1 = arith.constant 0 : index
    %c0_2 = arith.constant 0 : index
    %1 = vector.load %arg5[%c0_1, %c0_2] : memref<128x128xf32, #tpu.memory_space<vmem>>, vector<128x128xf32>
    %2 = arith.mulf %0, %1 : vector<128x128xf32>
    %c0_3 = arith.constant 0 : index
    %c0_4 = arith.constant 0 : index
    %3 = vector.load %arg7[%c0_3, %c0_4] : memref<128x128xf32, #tpu.memory_space<vmem>>, vector<128x128xf32>
    %4 = tpu.transpose %3, [1, 0] : vector<128x128xf32> -> vector<128x128xf32>
    %c0_5 = arith.constant 0 : index
    %c0_6 = arith.constant 0 : index
    %5 = vector.load %arg6[%c0_5, %c0_6] : memref<128x128xf32, #tpu.memory_space<vmem>>, vector<128x128xf32>
    %6 = arith.mulf %4, %5 : vector<128x128xf32>
    %7 = arith.addf %2, %6 : vector<128x128xf32>
    %c0_7 = arith.constant 0 : index
    %c0_8 = arith.constant 0 : index
    %8 = vector.load %arg8[%c0_7, %c0_8] : memref<128x128xf32, #tpu.memory_space<vmem>>, vector<128x128xf32>
    %9 = tpu.transpose %8, [1, 0] : vector<128x128xf32> -> vector<128x128xf32>
    %10 = arith.mulf %7, %9 : vector<128x128xf32>
    %11 = arith.truncf %10 : vector<128x128xf32> to vector<128x128xbf16>
    %c0_9 = arith.constant 0 : index
    %c0_10 = arith.constant 0 : index
    %12 = vector.load %arg3[%c0_9, %c0_10] : memref<16x128xf32, #tpu.memory_space<vmem>>, vector<16x128xf32>
    %13 = arith.truncf %12 : vector<16x128xf32> to vector<16x128xbf16>
    %cst = arith.constant dense<0.000000e+00> : vector<16x128xf32>
    %14 = tpu.matmul %13, %11, %cst {dimension_numbers = #tpu.dot_dimension_numbers<[1], [0], [0], [1], [0, 0, 1, 1], [], []>} : vector<16x128xbf16>, vector<128x128xbf16>, vector<16x128xf32> -> vector<16x128xf32>
    %c0_i32 = arith.constant 0 : i32
    %15 = arith.cmpi eq, %arg2, %c0_i32 : i32
    %16 = arith.extui %15 : i1 to i32
    %c0_i32_11 = arith.constant 0 : i32
    %17 = arith.cmpi ne, %16, %c0_i32_11 : i32
    scf.if %17 {
      %c0_14 = arith.constant 0 : index
      %c0_15 = arith.constant 0 : index
      %21 = vector.load %arg9[%c0_14, %c0_15] : memref<1x128xf32, #tpu.memory_space<vmem>>, vector<1x128xf32>
      %22 = vector.broadcast %21 : vector<1x128xf32> to vector<16x128xf32>
      %23 = arith.addf %14, %22 : vector<16x128xf32>
      %c0_16 = arith.constant 0 : index
      %c0_17 = arith.constant 0 : index
      %24 = vector.load %arg10[%c0_16, %c0_17] : memref<16x128xf32, #tpu.memory_space<vmem>>, vector<16x128xf32>
      tpu.vector_store %arg10[%c0_16, %c0_17], %23 {strides = array<i32>} : memref<16x128xf32, #tpu.memory_space<vmem>>, vector<16x128xf32>,
    } else {
    }
    %c0_i32_12 = arith.constant 0 : i32
    %18 = arith.cmpi ne, %arg2, %c0_i32_12 : i32
    %19 = arith.extui %18 : i1 to i32
    %c0_i32_13 = arith.constant 0 : i32
    %20 = arith.cmpi ne, %19, %c0_i32_13 : i32
    scf.if %20 {
      %c0_14 = arith.constant 0 : index
      %c0_15 = arith.constant 0 : index
      %21 = vector.load %arg10[%c0_14, %c0_15] : memref<16x128xf32, #tpu.memory_space<vmem>>, vector<16x128xf32>
      %22 = arith.addf %21, %14 : vector<16x128xf32>
      %c0_16 = arith.constant 0 : index
      %c0_17 = arith.constant 0 : index
      %23 = vector.load %arg10[%c0_16, %c0_17] : memref<16x128xf32, #tpu.memory_space<vmem>>, vector<16x128xf32>
      tpu.vector_store %arg10[%c0_16, %c0_17], %22 {strides = array<i32>} : memref<16x128xf32, #tpu.memory_space<vmem>>, vector<16x128xf32>,
    } else {
    }
    return
  }
  func.func @transform_0(%arg0: i32, %arg1: i32, %arg2: i32) -> (i32, i32) {
    %c0_i32 = arith.constant 0 : i32
    return %arg0, %arg2 : i32, i32
  }
  func.func @transform_1(%arg0: i32, %arg1: i32, %arg2: i32) -> (i32, i32) {
    %c0_i32 = arith.constant 0 : i32
    return %arg2, %arg1 : i32, i32
  }
  func.func @transform_2(%arg0: i32, %arg1: i32, %arg2: i32) -> (i32, i32) {
    %c0_i32 = arith.constant 0 : i32
    return %arg2, %arg1 : i32, i32
  }
  func.func @transform_3(%arg0: i32, %arg1: i32, %arg2: i32) -> (i32, i32) {
    %c0_i32 = arith.constant 0 : i32
    return %arg2, %arg1 : i32, i32
  }
  func.func @transform_4(%arg0: i32, %arg1: i32, %arg2: i32) -> (i32, i32) {
    %c0_i32 = arith.constant 0 : i32
    return %arg1, %arg2 : i32, i32
  }
  func.func @transform_5(%arg0: i32, %arg1: i32, %arg2: i32) -> (i32, i32) {
    %c0_i32 = arith.constant 0 : i32
    return %arg1, %arg2 : i32, i32
  }
  func.func @transform_6(%arg0: i32, %arg1: i32, %arg2: i32) -> (i32, i32) {
    %c0_i32 = arith.constant 0 : i32
    %c0_i32_0 = arith.constant 0 : i32
    return %c0_i32, %arg1 : i32, i32
  }
  func.func @transform_7(%arg0: i32, %arg1: i32, %arg2: i32) -> (i32, i32) {
    %c0_i32 = arith.constant 0 : i32
    return %arg0, %arg1 : i32, i32
  }
}

</mosaic_0001>

<bundles_post_ra>
// kernel: self_connected_sparse_forward.1
= control target key start
LH: loop header
LB: loop body
LE: loop exit
PB: predicated region body
PF: predicated region fallthrough
CT: control target
= control target key end

     0   :  { %12 = vsyncpa [#allocation3], 0  ;;  %s722_s0 = inlined_call_operand.hbm [shape: f32[16,128], index: 0, kind: input, shape index: {}]   ;;  %s723_s1 = inlined_call_operand.hbm [shape: f32[128,128], index: 1, kind: input, shape index: {}, may-alias: {1,4}]   ;;  %s724_s2 = inlined_call_operand.hbm [shape: f32[128,128], index: 2, kind: input, shape index: {}]   ;;  %s725_s3 = inlined_call_operand.hbm [shape: f32[128,128], index: 3, kind: input, shape index: {}]   ;;  %s726_s4 = inlined_call_operand.hbm [shape: f32[128,128], index: 4, kind: input, shape index: {}, may-alias: {1,4}]   ;;  %s727_s5 = inlined_call_operand.hbm [shape: f32[128,128], index: 5, kind: input, shape index: {}]   ;;  %s728_s6 = inlined_call_operand.vmem [shape: f32[1,128], index: 6, kind: input, shape index: {}]   ;;  %s729_s7 = inlined_call_operand.hbm [shape: f32[16,128], index: 7, kind: output, shape index: {}]  }
   0x1   :  { %13 = vsyncpa [#allocation6], 0 }
   0x2   :  { %14 = vsyncpa [#allocation9], 0 }
   0x3   :  { %15 = vsyncpa [#allocation12], 0 }
   0x4   :  { %16 = vsyncpa [#allocation4], 0  ;;  %s34_s26 = sshll.u32 %s723_s1, 4  ;;  %s586_s27 = smov [#allocation5]   ;;  %s35_s26 = int_to_ptr.hbm [resolvable:$true] %s34_s26 }
   0x5   :  { %s36_s28 = sshll.u32 %s586_s27, 4  ;;  %s60_s8 = sshll.u32 %s725_s3, 4  ;;  %s37_s28 = int_to_ptr.vmem [resolvable:$true] %s36_s28  ;;  %s61_s8 = int_to_ptr.hbm [resolvable:$true] %s60_s8 }
   0x6   :  { %s587_s9 = smov 128   ;;  %s588_s10 = smov 8  }
   0x7   :  { %42 = dma.hbm_to_vmem [thread:$0]  %s35_s26, 2048, %s37_s28, [#allocation6], %s587_s9, %s587_s9, %s588_s10  }
   0x8   :  { %s589_s11 = smov [#allocation8]   ;;  %s21_s1 = sshll.u32 %s722_s0, 4  ;;  %s22_s1 = int_to_ptr.hbm [resolvable:$true] %s21_s1 }
   0x9   :  { %s62_s12 = sshll.u32 %s589_s11, 4  ;;  %s47_s16 = sshll.u32 %s724_s2, 4  ;;  %s63_s12 = int_to_ptr.vmem [resolvable:$true] %s62_s12  ;;  %s48_s16 = int_to_ptr.hbm [resolvable:$true] %s47_s16 }
   0xa   :  { %68 = dma.hbm_to_vmem [thread:$0]  %s61_s8, 2048, %s63_s12, [#allocation9], %s587_s9, %s587_s9, %s588_s10  }
   0xb   :  { %s590_s17 = smov [#allocation2]   ;;  %s591_s19 = smov [#allocation7]  }
   0xc   :  { %s23_s18 = sshll.u32 %s590_s17, 4  ;;  %s49_s0 = sshll.u32 %s591_s19, 4  ;;  %s24_s18 = int_to_ptr.vmem [resolvable:$true] %s23_s18  ;;  %s50_s0 = int_to_ptr.vmem [resolvable:$true] %s49_s0 }
   0xd   :  { %29 = dma.hbm_to_vmem [thread:$0]  %s22_s1, 256, %s24_s18, [#allocation3], %s587_s9, %s587_s9, %s588_s10  }
   0xe   :  { %s73_s22 = sshll.u32 %s726_s4, 4  ;;  %s86_s24 = sshll.u32 %s727_s5, 4  ;;  %s74_s22 = int_to_ptr.hbm [resolvable:$true] %s73_s22  ;;  %s87_s24 = int_to_ptr.hbm [resolvable:$true] %s86_s24 }
   0xf   :  { %55 = dma.hbm_to_vmem [thread:$0]  %s48_s16, 2048, %s50_s0, [#allocation6], %s587_s9, %s587_s9, %s588_s10  }
  0x10   :  { %s592_s25 = smov [#allocation10]   ;;  %s593_s27 = smov [#allocation11]  }
  0x11   :  { %s75_s26 = sshll.u32 %s592_s25, 4  ;;  %s88_s4 = sshll.u32 %s593_s27, 4  ;;  %s76_s26 = int_to_ptr.vmem [resolvable:$true] %s75_s26  ;;  %s89_s4 = int_to_ptr.vmem [resolvable:$true] %s88_s4 }
  0x12   :  { %81 = dma.hbm_to_vmem [thread:$0]  %s74_s22, 2048, %s76_s26, [#allocation9], %s587_s9, %s587_s9, %s588_s10  }
  0x13   :  { %94 = dma.hbm_to_vmem [thread:$0]  %s87_s24, 2048, %s89_s4, [#allocation12], %s587_s9, %s587_s9, %s588_s10  }
  0x14   :  { %576 = dma.done.wait [#allocation3], 256  }
  0x15   :  { %577 = vsyncadd [#allocation3], 4294967040 }
  0x16   :  { %578 = dma.done.wait [#allocation6], 4096  }
  0x17   :  { %579 = vsyncadd [#allocation6], 4294963200 }
  0x18   :  { %580 = dma.done.wait [#allocation9], 4096  }
  0x19   :  { %581 = vsyncadd [#allocation9], 4294963200 }
  0x1a   :  { %582 = dma.done.wait [#allocation12], 2048  }
  0x1b   :  { %583 = vsyncadd [#allocation12], 4294965248  ;;  %v169_v0 = vld [vmem:[#allocation10] sm:$0xff]  ;;  %v170_v2 = vld [vmem:[#allocation10 + $0x8] sm:$0xff]  ;;  %s594_s29 = smov [#allocation13]   ;;  %s382_s12 = sshll.u32 %s729_s7, 4  ;;  %s383_s12 = int_to_ptr.hbm [resolvable:$true] %s382_s12 }
  0x1c   :  { %v265_v1 = vld [vmem:[#allocation11] sm:$0xff]  ;;  %185 = vxpose.xlu0.b32.start [1/16] %v169_v0, 128  ;;  %v266_v3 = vld [vmem:[#allocation11 + $0x8] sm:$0xff]  ;;  %v171_v4 = vld [vmem:[#allocation10 + $0x10] sm:$0xff]  ;;  %s380_s30 = sshll.u32 %s594_s29, 4  ;;  %s381_s30 = int_to_ptr.vmem [resolvable:$true] %s380_s30 }
  0x1d   :  { %281 = vxpose.xlu1.b32.start [1/16] %v265_v1, 128  ;;  %v267_v5 = vld [vmem:[#allocation11 + $0x10] sm:$0xff]  ;;  %v172_v6 = vld [vmem:[#allocation10 + $0x18] sm:$0xff]  ;;  %v173_v8 = vld [vmem:[#allocation10 + $0x20] sm:$0xff] }
  0x1e   :  { %v268_v7 = vld [vmem:[#allocation11 + $0x18] sm:$0xff]  ;;  %v269_v9 = vld [vmem:[#allocation11 + $0x20] sm:$0xff]  ;;  %v174_v10 = vld [vmem:[#allocation10 + $0x28] sm:$0xff] }
  0x1f   :  { %v270_v11 = vld [vmem:[#allocation11 + $0x28] sm:$0xff]  ;;  %v175_v12 = vld [vmem:[#allocation10 + $0x30] sm:$0xff]  ;;  %v176_v14 = vld [vmem:[#allocation10 + $0x38] sm:$0xff] }
  0x20   :  { %v271_v13 = vld [vmem:[#allocation11 + $0x30] sm:$0xff]  ;;  %v272_v15 = vld [vmem:[#allocation11 + $0x38] sm:$0xff]  ;;  %v177_v16 = vld [vmem:[#allocation10 + $0x40] sm:$0xff] }
  0x21   :  { %v273_v17 = vld [vmem:[#allocation11 + $0x40] sm:$0xff]  ;;  %v178_v18 = vld [vmem:[#allocation10 + $0x48] sm:$0xff]  ;;  %v179_v20 = vld [vmem:[#allocation10 + $0x50] sm:$0xff] }
  0x22   :  { %v274_v19 = vld [vmem:[#allocation11 + $0x48] sm:$0xff]  ;;  %v275_v21 = vld [vmem:[#allocation11 + $0x50] sm:$0xff]  ;;  %v180_v22 = vld [vmem:[#allocation10 + $0x58] sm:$0xff] }
  0x23   :  { %v276_v23 = vld [vmem:[#allocation11 + $0x58] sm:$0xff]  ;;  %v181_v24 = vld [vmem:[#allocation10 + $0x60] sm:$0xff]  ;;  %v182_v26 = vld [vmem:[#allocation10 + $0x68] sm:$0xff] }
  0x24   :  { %186 = vxpose.xlu0.b32.cont [2/16] %v170_v2, 128  ;;  %v277_v25 = vld [vmem:[#allocation11 + $0x60] sm:$0xff]  ;;  %v278_v27 = vld [vmem:[#allocation11 + $0x68] sm:$0xff]  ;;  %v183_v28 = vld [vmem:[#allocation10 + $0x70] sm:$0xff] }
  0x25   :  { %282 = vxpose.xlu1.b32.cont [2/16] %v266_v3, 128  ;;  %v279_v29 = vld [vmem:[#allocation11 + $0x70] sm:$0xff]  ;;  %v184_v30 = vld [vmem:[#allocation10 + $0x78] sm:$0xff]  ;;  %v121_v32 = vld [vmem:[#allocation5] sm:$0xff] }
  0x26   :  { %v280_v31 = vld [vmem:[#allocation11 + $0x78] sm:$0xff]  ;;  %v137_v33 = vld [vmem:[#allocation7] sm:$0xff]  ;;  %v122_v40 = vld [vmem:[#allocation5 + $0x8] sm:$0xff] }
  0x27   :  { %v217_v34 = vld [vmem:[#allocation8] sm:$0xff]  ;;  %v153_v35 = vmul.f32 %v137_v33, %v121_v32  ;;  %v138_v41 = vld [vmem:[#allocation7 + $0x8] sm:$0xff]  ;;  %v123_v49 = vld [vmem:[#allocation5 + $0x10] sm:$0xff] }
  0x28   :  { %v218_v43 = vld [vmem:[#allocation8 + $0x8] sm:$0xff]  ;;  %v154_v44 = vmul.f32 %v138_v41, %v122_v40  ;;  %v139_v50 = vld [vmem:[#allocation7 + $0x10] sm:$0xff]  ;;  %v124_v59 = vld [vmem:[#allocation5 + $0x18] sm:$0xff] }
  0x29   :  { %v219_v52 = vld [vmem:[#allocation8 + $0x10] sm:$0xff]  ;;  %v155_v53 = vmul.f32 %v139_v50, %v123_v49  ;;  %v140_v60 = vld [vmem:[#allocation7 + $0x18] sm:$0xff] }
  0x2a   :  { %v220_v62 = vld [vmem:[#allocation8 + $0x18] sm:$0xff]  ;;  %v156_v63 = vmul.f32 %v140_v60, %v124_v59 }
  0x2b   :  { %v128_v33 = vld [vmem:[#allocation5 + $0x38] sm:$0xff] }
  0x2c   :  { %187 = vxpose.xlu0.b32.cont [3/16] %v171_v4, 128  ;;  %v125_v4 = vld [vmem:[#allocation5 + $0x20] sm:$0xff] }
  0x2d   :  { %283 = vxpose.xlu1.b32.cont [3/16] %v267_v5, 128  ;;  %v141_v5 = vld [vmem:[#allocation7 + $0x20] sm:$0xff] }
  0x34   :  { %188 = vxpose.xlu0.b32.cont [4/16] %v172_v6, 128 }
  0x35   :  { %284 = vxpose.xlu1.b32.cont [4/16] %v268_v7, 128  ;;  %v221_v7 = vld [vmem:[#allocation8 + $0x20] sm:$0xff] }
  0x3c   :  { %189 = vxpose.xlu0.b32.cont [5/16] %v173_v8, 128  ;;  %v157_v8 = vmul.f32 %v141_v5, %v125_v4  ;;  %v231_v5 = vld [vmem:[#allocation8 + $0x70] sm:$0xff] }
  0x3d   :  { %285 = vxpose.xlu1.b32.cont [5/16] %v269_v9, 128 }
  0x44   :  { %190 = vxpose.xlu0.b32.cont [6/16] %v174_v10, 128 }
  0x45   :  { %286 = vxpose.xlu1.b32.cont [6/16] %v270_v11, 128 }
  0x4c   :  { %191 = vxpose.xlu0.b32.cont [7/16] %v175_v12, 128 }
  0x4d   :  { %287 = vxpose.xlu1.b32.cont [7/16] %v271_v13, 128 }
  0x54   :  { %192 = vxpose.xlu0.b32.cont [8/16] %v176_v14, 128  ;;  %v126_v14 = vld [vmem:[#allocation5 + $0x28] sm:$0xff] }
  0x55   :  { %288 = vxpose.xlu1.b32.cont [8/16] %v272_v15, 128  ;;  %v142_v15 = vld [vmem:[#allocation7 + $0x28] sm:$0xff] }
  0x5c   :  { %193 = vxpose.xlu0.b32.cont [9/16] %v177_v16, 128 }
  0x5d   :  { %289 = vxpose.xlu1.b32.cont [9/16] %v273_v17, 128  ;;  %v222_v17 = vld [vmem:[#allocation8 + $0x28] sm:$0xff] }
  0x64   :  { %194 = vxpose.xlu0.b32.cont [10/16] %v178_v18, 128  ;;  %v158_v18 = vmul.f32 %v142_v15, %v126_v14  ;;  %v152_v14 = vld [vmem:[#allocation7 + $0x78] sm:$0xff]  ;;  %v229_v15 = vld [vmem:[#allocation8 + $0x60] sm:$0xff] }
  0x65   :  { %290 = vxpose.xlu1.b32.cont [10/16] %v274_v19, 128 }
  0x6c   :  { %195 = vxpose.xlu0.b32.cont [11/16] %v179_v20, 128 }
  0x6d   :  { %291 = vxpose.xlu1.b32.cont [11/16] %v275_v21, 128 }
  0x74   :  { %196 = vxpose.xlu0.b32.cont [12/16] %v180_v22, 128 }
  0x75   :  { %292 = vxpose.xlu1.b32.cont [12/16] %v276_v23, 128  ;;  %v127_v23 = vld [vmem:[#allocation5 + $0x30] sm:$0xff] }
  0x7c   :  { %197 = vxpose.xlu0.b32.cont [13/16] %v181_v24, 128  ;;  %v143_v24 = vld [vmem:[#allocation7 + $0x30] sm:$0xff] }
  0x7d   :  { %293 = vxpose.xlu1.b32.cont [13/16] %v277_v25, 128 }
  0x84   :  { %198 = vxpose.xlu0.b32.cont [14/16] %v182_v26, 128  ;;  %v223_v26 = vld [vmem:[#allocation8 + $0x30] sm:$0xff] }
  0x85   :  { %294 = vxpose.xlu1.b32.cont [14/16] %v278_v27, 128  ;;  %v159_v27 = vmul.f32 %v143_v24, %v127_v23 }
  0x8c   :  { %199 = vxpose.xlu0.b32.cont [15/16] %v183_v28, 128 }
  0x8d   :  { %295 = vxpose.xlu1.b32.cont [15/16] %v279_v29, 128 }
  0x94   :  { %200 = vxpose.xlu0.b32.end [16/16] %v184_v30, 128 }
  0x95   :  { %296 = vxpose.xlu1.b32.end [16/16] %v280_v31, 128 }
  0xc0   :  { %v201_v36 = vpop.trf.xlu0 }
  0xc1   :  { %v297_v37 = vpop.trf.xlu1  ;;  %v233_v38 = vmul.f32 %v217_v34, %v201_v36  ;;  %v144_v34 = vld [vmem:[#allocation7 + $0x38] sm:$0xff] }
  0xc2   :  { %v224_v36 = vld [vmem:[#allocation8 + $0x38] sm:$0xff] }
  0xc3   :  { %v249_v39 = vadd.f32 %v233_v38, %v153_v35 }
  0xc5   :  { %v671_v42 = vmul.f32 %v297_v37, %v249_v39  ;;  %v160_v37 = vmul.f32 %v144_v34, %v128_v33 }
  0xc8   :  { %v202_v45 = vpop.trf.xlu0 }
  0xc9   :  { %v298_v46 = vpop.trf.xlu1  ;;  %v234_v47 = vmul.f32 %v218_v43, %v202_v45  ;;  %v129_v43 = vld [vmem:[#allocation5 + $0x40] sm:$0xff] }
  0xcb   :  { %v250_v48 = vadd.f32 %v234_v47, %v154_v44  ;;  %v145_v44 = vld [vmem:[#allocation7 + $0x40] sm:$0xff] }
  0xcc   :  { %v161_v47 = vmul.f32 %v145_v44, %v129_v43 }
  0xcd   :  { %v673_v51 = vmul.f32 %v298_v46, %v250_v48  ;;  %v225_v46 = vld [vmem:[#allocation8 + $0x40] sm:$0xff] }
  0xcf   :  { %v329_v54 = vpack.c.bf16 %v673_v51, %v671_v42 }
  0xd0   :  { %v203_v55 = vpop.trf.xlu0 }
  0xd1   :  { %v299_v56 = vpop.trf.xlu1  ;;  %v235_v57 = vmul.f32 %v219_v52, %v203_v55 }
  0xd3   :  { %v251_v58 = vadd.f32 %v235_v57, %v155_v53 }
  0xd5   :  { %v677_v61 = vmul.f32 %v299_v56, %v251_v58 }
  0xd8   :  { %v204_v0 = vpop.trf.xlu0 }
  0xd9   :  { %v300_v1 = vpop.trf.xlu1  ;;  %v236_v2 = vmul.f32 %v220_v62, %v204_v0 }
  0xdb   :  { %v252_v3 = vadd.f32 %v236_v2, %v156_v63 }
  0xdd   :  { %v679_v6 = vmul.f32 %v300_v1, %v252_v3 }
  0xdf   :  { %v330_v9 = vpack.c.bf16 %v679_v6, %v677_v61 }
  0xe0   :  { %v205_v10 = vpop.trf.xlu0 }
  0xe1   :  { %v301_v11 = vpop.trf.xlu1  ;;  %v237_v12 = vmul.f32 %v221_v7, %v205_v10  ;;  %v135_v7 = vld [vmem:[#allocation5 + $0x70] sm:$0xff]  ;;  %v230_v10 = vld [vmem:[#allocation8 + $0x68] sm:$0xff] }
  0xe3   :  { %v253_v13 = vadd.f32 %v237_v12, %v157_v8  ;;  %v151_v8 = vld [vmem:[#allocation7 + $0x70] sm:$0xff]  ;;  %v150_v12 = vld [vmem:[#allocation7 + $0x68] sm:$0xff] }
  0xe5   :  { %v683_v16 = vmul.f32 %v301_v11, %v253_v13  ;;  %v134_v11 = vld [vmem:[#allocation5 + $0x68] sm:$0xff]  ;;  %v136_v13 = vld [vmem:[#allocation5 + $0x78] sm:$0xff] }
  0xe6   :  { %v166_v23 = vmul.f32 %v150_v12, %v134_v11  ;;  %v168_v24 = vmul.f32 %v152_v14, %v136_v13 }
  0xe8   :  { %v206_v19 = vpop.trf.xlu0 }
  0xe9   :  { %v302_v20 = vpop.trf.xlu1  ;;  %v238_v21 = vmul.f32 %v222_v17, %v206_v19  ;;  %v133_v19 = vld [vmem:[#allocation5 + $0x60] sm:$0xff] }
  0xeb   :  { %v254_v22 = vadd.f32 %v238_v21, %v158_v18  ;;  %v167_v18 = vmul.f32 %v151_v8, %v135_v7  ;;  %v232_v21 = vld [vmem:[#allocation8 + $0x78] sm:$0xff] }
  0xed   :  { %v685_v25 = vmul.f32 %v302_v20, %v254_v22  ;;  %v149_v20 = vld [vmem:[#allocation7 + $0x60] sm:$0xff] }
  0xee   :  { %v165_v34 = vmul.f32 %v149_v20, %v133_v19 }
  0xef   :  { %v331_v28 = vpack.c.bf16 %v685_v25, %v683_v16 }
  0xf0   :  { %v207_v29 = vpop.trf.xlu0 }
  0xf1   :  { %v303_v30 = vpop.trf.xlu1  ;;  %v239_v31 = vmul.f32 %v223_v26, %v207_v29  ;;  %v228_v26 = vld [vmem:[#allocation8 + $0x58] sm:$0xff] }
  0xf2   :  { %v148_v29 = vld [vmem:[#allocation7 + $0x58] sm:$0xff] }
  0xf3   :  { %v255_v32 = vadd.f32 %v239_v31, %v159_v27  ;;  %v132_v27 = vld [vmem:[#allocation5 + $0x58] sm:$0xff]  ;;  %v131_v31 = vld [vmem:[#allocation5 + $0x50] sm:$0xff] }
  0xf4   :  { %v164_v44 = vmul.f32 %v148_v29, %v132_v27 }
  0xf5   :  { %v689_v35 = vmul.f32 %v303_v30, %v255_v32  ;;  %v147_v32 = vld [vmem:[#allocation7 + $0x50] sm:$0xff] }
  0xf8   :  { %v208_v38 = vpop.trf.xlu0 }
  0xf9   :  { %v304_v39 = vpop.trf.xlu1  ;;  %v240_v40 = vmul.f32 %v224_v36, %v208_v38  ;;  %v227_v38 = vld [vmem:[#allocation8 + $0x50] sm:$0xff] }
  0xfb   :  { %v256_v41 = vadd.f32 %v240_v40, %v160_v37  ;;  %v130_v40 = vld [vmem:[#allocation5 + $0x48] sm:$0xff] }
  0xfd   :  { %v691_v45 = vmul.f32 %v304_v39, %v256_v41  ;;  %v146_v41 = vld [vmem:[#allocation7 + $0x48] sm:$0xff] }
  0xff   :  { %v332_v48 = vpack.c.bf16 %v691_v45, %v689_v35  ;;  %v407_v35 = vld [vmem:[%s728_s6] ss:$0 sm:$0xff] }
 0x100   :  { %v209_v49 = vpop.trf.xlu0 }
 0x101   :  { %v305_v50 = vpop.trf.xlu1  ;;  %v241_v52 = vmul.f32 %v225_v46, %v209_v49  ;;  %v226_v49 = vld [vmem:[#allocation8 + $0x48] sm:$0xff] }
 0x103   :  { %v257_v53 = vadd.f32 %v241_v52, %v161_v47 }
 0x105   :  { %v695_v55 = vmul.f32 %v305_v50, %v257_v53  ;;  %v163_v50 = vmul.f32 %v147_v32, %v131_v31 }
 0x108   :  { %v210_v56 = vpop.trf.xlu0 }
 0x109   :  { %v697_v57 = vpop.trf.xlu1  ;;  %v242_v7 = vmul.f32 %v226_v49, %v210_v56  ;;  %v337_v56 = vld [vmem:[#allocation2] sm:$0xff] }
 0x110   :  { %v211_v58 = vpop.trf.xlu0 }
 0x111   :  { %v307_v59 = vpop.trf.xlu1  ;;  %v243_v52 = vmul.f32 %v227_v38, %v211_v58 }
 0x113   :  { %v259_v11 = vadd.f32 %v243_v52, %v163_v50 }
 0x118   :  { %v212_v60 = vpop.trf.xlu0 }
 0x119   :  { %v308_v62 = vpop.trf.xlu1  ;;  %v244_v43 = vmul.f32 %v228_v26, %v212_v60 }
 0x120   :  { %v213_v63 = vpop.trf.xlu0 }
 0x121   :  { %v309_v0 = vpop.trf.xlu1  ;;  %v245_v33 = vmul.f32 %v229_v15, %v213_v63  ;;  %v260_v63 = vadd.f32 %v244_v43, %v164_v44  ;;  %v323_v15 = vmul.f32 %v307_v59, %v259_v11  ;;  %v338_v59 = vld [vmem:[#allocation2 + $0x8] sm:$0xff] }
 0x123   :  { %v261_v53 = vadd.f32 %v245_v33, %v165_v34  ;;  %v324_v14 = vmul.f32 %v308_v62, %v260_v63 }
 0x125   :  { %v325_v12 = vmul.f32 %v309_v0, %v261_v53 }
 0x128   :  { %v214_v1 = vpop.trf.xlu0 }
 0x129   :  { %v310_v2 = vpop.trf.xlu1  ;;  %v246_v22 = vmul.f32 %v230_v10, %v214_v1 }
 0x12b   :  { %v262_v46 = vadd.f32 %v246_v22, %v166_v23 }
 0x12d   :  { %v326_v8 = vmul.f32 %v310_v2, %v262_v46 }
 0x12f   :  { %v335_v60 = vpack.c.bf16 %v326_v8, %v325_v12 }
 0x130   :  { %v215_v3 = vpop.trf.xlu0 }
 0x131   :  { %v311_v4 = vpop.trf.xlu1  ;;  %v247_v17 = vmul.f32 %v231_v5, %v215_v3  ;;  %v162_v5 = vmul.f32 %v146_v41, %v130_v40 }
 0x133   :  { %v263_v36 = vadd.f32 %v247_v17, %v167_v18  ;;  %v258_v13 = vadd.f32 %v242_v7, %v162_v5  ;;  %v334_v18 = vpack.c.bf16 %v324_v14, %v323_v15 }
 0x135   :  { %v327_v1 = vmul.f32 %v311_v4, %v263_v36  ;;  %v322_v17 = vmul.f32 %v697_v57, %v258_v13  ;;  %v339_v57 = vpack.c.bf16 %v338_v59, %v337_v56 }
 0x137   :  { %v333_v58 = vpack.c.bf16 %v322_v17, %v695_v55 }
 0x138   :  { %v216_v30 = vpop.trf.xlu0 }
 0x139   :  { %v248_v37 = vmul.f32 %v232_v21, %v216_v30  ;;  %v312_v39 = vpop.trf.xlu1 }
 0x13b   :  { %v264_v47 = vadd.f32 %v248_v37, %v168_v24 }
 0x13d   :  { %v328_v3 = vmul.f32 %v312_v39, %v264_v47 }
 0x13f   :  { %v336_v10 = vpack.c.bf16 %v328_v3, %v327_v1 }
 0x141   :  { %340 = vmatpush.bf16.msra.mxu0 %v336_v10 }
 0x145   :  { %341 = vmatpush.bf16.msra.mxu0 %v335_v60 }
 0x149   :  { %342 = vmatpush.bf16.msra.mxu0 %v334_v18 }
 0x14d   :  { %343 = vmatpush.bf16.msra.mxu0 %v333_v58 }
 0x151   :  { %344 = vmatpush.bf16.msra.mxu0 %v332_v48 }
 0x155   :  { %345 = vmatpush.bf16.msra.mxu0 %v331_v28 }
 0x159   :  { %346 = vmatpush.bf16.msra.mxu0 %v330_v9 }
 0x15d   :  { %347 = vmatpush.bf16.msra.mxu0 %v329_v54 }
 0x160   :  { %348 = vmatmul.bf16.vlgmr.msra.gmra.mxu0 %v339_v57 }
 0x1dd   :  { %v349_v45 = vpop.f32.mrf.mxu0 }
 0x1de   :  { %v362_v48 = vadd.f32 %v407_v35, %v349_v45 }
 0x1e0   :  { %364 = vst [vmem:[#allocation13] sm:$0xff] %v362_v48 }
 0x1e5   :  { %v351_v61 = vpop.f32.mrf.mxu0 }
 0x1e6   :  { %v363_v6 = vadd.f32 %v407_v35, %v351_v61 }
 0x1e8   :  { %365 = vst [vmem:[#allocation13 + $0x8] sm:$0xff] %v363_v6 }
 0x1e9   :  { %388 = dma.vmem_to_hbm [thread:$0]  %s381_s30, 256, %s383_s12, [#allocation4], %s587_s9, %s587_s9, %s588_s10  }
 0x1ea   :  { %584 = dma.done.wait [#allocation4], 256  }
 0x1eb   :  { %585 = vsyncadd [#allocation4], 4294967040 }
 0x1ec   :  { %393 = vsyncpa [#allocation3], 1 }
 0x1ed   :  { %394 = vsyncpa [#allocation6], 1 }
 0x1ee   :  { %395 = vsyncpa [#allocation9], 1 }
 0x1ef   :  { %396 = vsyncpa [#allocation12], 1 }
 0x1f0   :  { %397 = vsyncpa [#allocation4], 1 }

</bundles_post_ra>
